<compile_context>
chip_gen: v7x
topology: tpu7x:2x2x1
jax: 0.10.0
libtpu: 0.0.40
codegen_flags: <defaults>
</compile_context>

<pallas_src>
import functools

import jax
import jax.numpy as jnp
from jax import lax
from jax.experimental import pallas as pl
from jax.experimental.pallas import tpu as pltpu

_MIB = 1024 * 1024


def _round_up(x, m):
    return -(-x // m) * m


def _pick_tile(n, target, align=8):
    """Largest divisor of n that is <= target and a multiple of `align`
    (TPU (8,128) block constraint on non-full dims); falls back to n."""
    if n <= target:
        return n
    t = (target // align) * align
    while t >= align:
        if n % t == 0:
            return t
        t -= align
    return n


def _pick_tb(B, target=64):
    cap = min(target, B)
    if B >= 16:
        # Prefer >= 2 batch tiles so the "parallel" B axis can feed both v7x
        # TensorCores (no effect on single-TC v5e / v6e).
        cap = min(cap, max(8, B // 2))
    return _pick_tile(B, cap, align=8)


def _vmem_capacity_bytes():
    try:
        info = pltpu.get_tpu_info()
        cap = getattr(info, "vmem_capacity_bytes", None)
        if cap:
            return int(cap)
    except Exception:
        pass
    return 64 * _MIB  # conservative default (v7x per-TC VMEM)


def prediction_kernel(p_ref, h_ref, w1_ref, b1_ref, w2_ref, b2_ref, o_ref,
                      sum_p, max_p, sum_h, max_h, feat,
                      *, seq_len, fold, valid_rows, tl, needs_mask):
    l = pl.program_id(1)
    nl = pl.num_programs(1)

    p = p_ref[...]                       # (tb, tl, W) native dtype, lane-dense
    h = h_ref[...]

    if needs_mask:
        # Tail tile contains zero-padded rows: zeros are neutral for the sum,
        # but the max needs padded rows masked to the dtype minimum.
        rows = l * tl + lax.broadcasted_iota(jnp.int32, p.shape, 1)
        valid = rows < valid_rows
        neg = jnp.asarray(jnp.finfo(p.dtype).min, dtype=p.dtype)
        p_max_in = jnp.where(valid, p, neg)
        h_max_in = jnp.where(valid, h, neg)
    else:
        p_max_in = p
        h_max_in = h

    # Per-tile partial reductions over the streamed (folded) sequence axis.
    psum = jnp.sum(p, axis=1, dtype=jnp.float32)             # (tb, W) f32
    pmax = jnp.max(p_max_in, axis=1).astype(jnp.float32)
    hsum = jnp.sum(h, axis=1, dtype=jnp.float32)
    hmax = jnp.max(h_max_in, axis=1).astype(jnp.float32)

    @pl.when(l == 0)
    def _init():
        sum_p[...] = psum
        max_p[...] = pmax
        sum_h[...] = hsum
        max_h[...] = hmax

    @pl.when(l > 0)
    def _accumulate():
        sum_p[...] = sum_p[...] + psum
        max_p[...] = jnp.maximum(max_p[...], pmax)
        sum_h[...] = sum_h[...] + hsum
        max_h[...] = jnp.maximum(max_h[...], hmax)

    @pl.when(l == nl - 1)
    def _finalize():
        w = sum_p.shape[1]
        d = w // fold
        inv_len = jnp.float32(1.0 / seq_len)

        def fold_add(ref):
            acc = ref[:, 0:d]
            for g in range(1, fold):
                acc = acc + ref[:, g * d:(g + 1) * d]
            return acc

        def fold_max(ref):
            acc = ref[:, 0:d]
            for g in range(1, fold):
                acc = jnp.maximum(acc, ref[:, g * d:(g + 1) * d])
            return acc

        # Pack the four pooled (tb, d) features into one lane-contiguous
        # (tb, 4*d) slab so the first Linear is a single K=4*d MXU dot.
        feat[:, 0 * d:1 * d] = fold_add(sum_p) * inv_len
        feat[:, 1 * d:2 * d] = fold_max(max_p)
        feat[:, 2 * d:3 * d] = fold_add(sum_h) * inv_len
        feat[:, 3 * d:4 * d] = fold_max(max_h)

        # TODO(synk): nn.Dropout is identity in eval mode; training-mode
        # dropout (random masking + 1/(1-p) scaling) is not applied.
        pre = jnp.dot(feat[...], w1_ref[...],
                      preferred_element_type=jnp.float32) + b1_ref[...]
        hid = jnp.tanh(pre)
        out = jnp.dot(hid, w2_ref[...],
                      preferred_element_type=jnp.float32) + b2_ref[...]
        o_ref[...] = out.astype(o_ref.dtype)


def prediction_forward(p, h, w1, b1, w2, b2, *, tb_target=64):
    B, L, D = p.shape
    Bh, Lh, Dh = h.shape
    assert (B, D) == (Bh, Dh), "p and h must share batch and feature dims"
    # TODO(synk): different sequence lengths for p and h are not supported by
    # the shared-L streaming grid.
    assert L == Lh, "kernel streams p and h over a shared sequence grid"
    assert p.dtype == h.dtype

    len_v, len_mid = w1.shape
    assert len_v == 4 * D, "w1 first dim must be 4 * feature_dim"
    type_num = w2.shape[1]

    itemsize = jnp.dtype(p.dtype).itemsize
    sublane = {4: 8, 2: 16, 1: 32}.get(itemsize, 8)

    # ---- lane-fold: pack consecutive sequence positions into the lane axis
    # so streamed tiles are lane-dense (D=32 would waste 3/4 of each tile). --
    fold = 1
    if D < 128 and 128 % D == 0:
        fold = 128 // D
        while fold > 1 and L % fold != 0:
            fold //= 2
    W = fold * D
    Lr = L // fold
    if fold > 1:
        p = p.reshape(B, Lr, W)          # zero-cost: row-major contiguous
        h = h.reshape(B, Lr, W)

    # ---- per-generation VMEM budget (v7x: 64 MiB/TC, v5e/v6e: 128 MiB) -----
    vmem_cap = _vmem_capacity_bytes()
    if vmem_cap >= 100 * _MIB:           # v5e / v6e
        tile_budget = 12 * _MIB          # per streamed input tile
        vmem_ceiling = 80 * _MIB
    else:                                # v7x (or unknown: be conservative)
        tile_budget = 6 * _MIB
        vmem_ceiling = 44 * _MIB

    tb = _pick_tb(B, tb_target)

    padded_lane = _round_up(W, 128)
    bytes_per_row = tb * padded_lane * itemsize
    tl_cap = max(sublane, (tile_budget // bytes_per_row) // sublane * sublane)

    if Lr <= tl_cap:
        tl, L_pad = Lr, Lr
    else:
        tl = _pick_tile(Lr, tl_cap, align=sublane)
        if tl > tl_cap:                  # no aligned divisor fits: pad tail
            tl = tl_cap
        L_pad = _round_up(Lr, tl)

    needs_mask = L_pad != Lr
    if needs_mask:
        pad = L_pad - Lr
        p = jnp.pad(p, ((0, 0), (0, pad), (0, 0)))
        h = jnp.pad(h, ((0, 0), (0, pad), (0, 0)))

    grid = (B // tb, L_pad // tl)

    # ---- VMEM accounting with (sublane, 128-lane) padding included ---------
    wbytes = jnp.dtype(w1.dtype).itemsize
    in_tile_bytes = tb * _round_up(tl, sublane) * padded_lane * itemsize
    need = 2 * 2 * in_tile_bytes                                  # p,h x 2 buffers
    need += 2 * (w1.size + b1.size + w2.size + b2.size) * wbytes  # resident weights
    need += (4 * _round_up(tb, 8) * padded_lane
             + _round_up(tb, 8) * _round_up(len_v, 128)) * 4      # f32 scratch
    need += 2 * _round_up(tb, 8) * _round_up(type_num, 128) * 4   # output blocks
    vmem_limit = int(min(max(int(need * 1.5) + 4 * _MIB, 32 * _MIB), vmem_ceiling))

    cost = pl.CostEstimate(
        flops=int(4 * B * L * D
                  + 2 * B * (len_v * len_mid + len_mid * type_num)),
        transcendentals=int(B * len_mid),
        bytes_accessed=int((p.size + h.size) * itemsize
                           + (w1.size + b1.size + w2.size + b2.size) * wbytes
                           + B * type_num * 4),
    )

    kernel = functools.partial(
        prediction_kernel, seq_len=L, fold=fold, valid_rows=Lr, tl=tl,
        needs_mask=needs_mask)

    grid_spec = pltpu.PrefetchScalarGridSpec(
        num_scalar_prefetch=0,
        grid=grid,
        in_specs=[
            pl.BlockSpec((tb, tl, W), lambda i, l: (i, l, 0)),          # p
            pl.BlockSpec((tb, tl, W), lambda i, l: (i, l, 0)),          # h
            pl.BlockSpec((len_v, len_mid), lambda i, l: (0, 0)),        # w1
            pl.BlockSpec((1, len_mid), lambda i, l: (0, 0)),            # b1
            pl.BlockSpec((len_mid, type_num), lambda i, l: (0, 0)),     # w2
            pl.BlockSpec((1, type_num), lambda i, l: (0, 0)),           # b2
        ],
        out_specs=pl.BlockSpec((tb, type_num), lambda i, l: (i, 0)),
        scratch_shapes=[
            pltpu.VMEM((tb, W), jnp.float32),      # running sum of p
            pltpu.VMEM((tb, W), jnp.float32),      # running max of p (f32 keeps v5e bf16 path cheap)
            pltpu.VMEM((tb, W), jnp.float32),      # running sum of h
            pltpu.VMEM((tb, W), jnp.float32),      # running max of h
            pltpu.VMEM((tb, len_v), jnp.float32),  # packed pooled features
        ],
    )

    return pl.pallas_call(
        kernel,
        out_shape=jax.ShapeDtypeStruct((B, type_num), jnp.float32),
        grid_spec=grid_spec,
        compiler_params=pltpu.CompilerParams(
            dimension_semantics=("parallel", "arbitrary"),
            vmem_limit_bytes=vmem_limit,
        ),
        cost_estimate=cost,
    )(p, h, w1, b1, w2, b2)


def prediction_reference(p, h, w1, b1, w2, b2):
    vp_avg = jnp.sum(p, axis=1) / p.shape[1]
    vp_max = jnp.max(p, axis=1)
    vh_avg = jnp.sum(h, axis=1) / h.shape[1]
    vh_max = jnp.max(h, axis=1)
    feat = jnp.concatenate((vp_avg, vp_max, vh_avg, vh_max), axis=-1)
    hid = jnp.tanh(feat @ w1 + b1)
    return hid @ w2 + b2


if __name__ == "__main__":
    # Small, shape-consistent sizes: p, h are (B, L, D); len_v = 4*D.
    B, L, D = 2, 8, 32
    len_v = 4 * D          # 128
    len_mid = 32
    type_num = 4

    key = jax.random.PRNGKey(0)
    kp, kh, kw1, kb1, kw2, kb2 = jax.random.split(key, 6)

    p = jax.random.normal(kp, (B, L, D), dtype=jnp.float32)
    h = jax.random.normal(kh, (B, L, D), dtype=jnp.float32)

    # Deterministic parameter init (Linear-style fan-in scaling), stored as
    # (in, out) so the kernel uses x @ W + b.  (If importing from the PyTorch
    # module, transpose nn.Linear's (out, in) weights first.)
    lim1 = 1.0 / jnp.sqrt(len_v)
    lim2 = 1.0 / jnp.sqrt(len_mid)
    w1 = jax.random.uniform(kw1, (len_v, len_mid), jnp.float32, -lim1, lim1)
    b1 = jax.random.uniform(kb1, (1, len_mid), jnp.float32, -lim1, lim1)
    w2 = jax.random.uniform(kw2, (len_mid, type_num), jnp.float32, -lim2, lim2)
    b2 = jax.random.uniform(kb2, (1, type_num), jnp.float32, -lim2, lim2)

    out = prediction_forward(p, h, w1, b1, w2, b2)
    out = jax.block_until_ready(out)

    ref = prediction_reference(p, h, w1, b1, w2, b2)
    assert out.shape == (B, type_num)
    assert jnp.allclose(out, ref, atol=1e-5, rtol=1e-5), "mismatch vs reference"

    print("KERNEL_OK")
</pallas_src>

<mosaic_0001>
module attributes {stable_mosaic.version = 11 : i64} {
  func.func @prediction_kernel(%arg0: i32, %arg1: i32, %arg2: memref<2x2x128xf32, #tpu.memory_space<vmem>>, %arg3: memref<2x2x128xf32, #tpu.memory_space<vmem>>, %arg4: memref<128x32xf32, #tpu.memory_space<vmem>>, %arg5: memref<1x32xf32, #tpu.memory_space<vmem>>, %arg6: memref<32x4xf32, #tpu.memory_space<vmem>>, %arg7: memref<1x4xf32, #tpu.memory_space<vmem>>, %arg8: memref<2x4xf32, #tpu.memory_space<vmem>>, %arg9: memref<2x128xf32, #tpu.memory_space<vmem>>, %arg10: memref<2x128xf32, #tpu.memory_space<vmem>>, %arg11: memref<2x128xf32, #tpu.memory_space<vmem>>, %arg12: memref<2x128xf32, #tpu.memory_space<vmem>>, %arg13: memref<2x128xf32, #tpu.memory_space<vmem>>) attributes {dimension_semantics = [#tpu.dimension_semantics<parallel>, #tpu.dimension_semantics<arbitrary>], iteration_bounds = array<i64: 1, 1>, scalar_prefetch = 0 : i64, scratch_operands = 5 : i64, tpu.core_type = #tpu.core_type<tc>, window_params = [{transform_indices = @transform_0, window_bounds = array<i64: 2, 2, 128>}, {transform_indices = @transform_1, window_bounds = array<i64: 2, 2, 128>}, {pipeline_mode = #tpu.pipeline_mode<synchronous>, transform_indices = @transform_2, window_bounds = array<i64: 128, 32>}, {pipeline_mode = #tpu.pipeline_mode<synchronous>, transform_indices = @transform_3, window_bounds = array<i64: 1, 32>}, {pipeline_mode = #tpu.pipeline_mode<synchronous>, transform_indices = @transform_4, window_bounds = array<i64: 32, 4>}, {pipeline_mode = #tpu.pipeline_mode<synchronous>, transform_indices = @transform_5, window_bounds = array<i64: 1, 4>}, {transform_indices = @transform_6, window_bounds = array<i64: 2, 4>}]} {
    %c0 = arith.constant 0 : index
    %c0_0 = arith.constant 0 : index
    %c0_1 = arith.constant 0 : index
    %0 = vector.load %arg2[%c0, %c0_0, %c0_1] : memref<2x2x128xf32, #tpu.memory_space<vmem>>, vector<2x2x128xf32>
    %c0_2 = arith.constant 0 : index
    %c0_3 = arith.constant 0 : index
    %c0_4 = arith.constant 0 : index
    %1 = vector.load %arg3[%c0_2, %c0_3, %c0_4] : memref<2x2x128xf32, #tpu.memory_space<vmem>>, vector<2x2x128xf32>
    %cst = arith.constant dense<0.000000e+00> : vector<2x128xf32>
    %2 = vector.multi_reduction <add>, %0, %cst [1] : vector<2x2x128xf32> to vector<2x128xf32>
    %cst_5 = arith.constant dense<0xFF800000> : vector<2x128xf32>
    %3 = vector.multi_reduction <maximumf>, %0, %cst_5 [1] : vector<2x2x128xf32> to vector<2x128xf32>
    %cst_6 = arith.constant dense<0.000000e+00> : vector<2x128xf32>
    %4 = vector.multi_reduction <add>, %1, %cst_6 [1] : vector<2x2x128xf32> to vector<2x128xf32>
    %cst_7 = arith.constant dense<0xFF800000> : vector<2x128xf32>
    %5 = vector.multi_reduction <maximumf>, %1, %cst_7 [1] : vector<2x2x128xf32> to vector<2x128xf32>
    %c0_i32 = arith.constant 0 : i32
    %6 = arith.cmpi eq, %arg1, %c0_i32 : i32
    %7 = arith.extui %6 : i1 to i32
    %c0_i32_8 = arith.constant 0 : i32
    %8 = arith.cmpi ne, %7, %c0_i32_8 : i32
    scf.if %8 {
      %c0_13 = arith.constant 0 : index
      %c0_14 = arith.constant 0 : index
      %15 = vector.load %arg9[%c0_13, %c0_14] : memref<2x128xf32, #tpu.memory_space<vmem>>, vector<2x128xf32>
      tpu.vector_store %arg9[%c0_13, %c0_14], %2 {strides = array<i32>} : memref<2x128xf32, #tpu.memory_space<vmem>>, vector<2x128xf32>,
      %c0_15 = arith.constant 0 : index
      %c0_16 = arith.constant 0 : index
      %16 = vector.load %arg10[%c0_15, %c0_16] : memref<2x128xf32, #tpu.memory_space<vmem>>, vector<2x128xf32>
      tpu.vector_store %arg10[%c0_15, %c0_16], %3 {strides = array<i32>} : memref<2x128xf32, #tpu.memory_space<vmem>>, vector<2x128xf32>,
      %c0_17 = arith.constant 0 : index
      %c0_18 = arith.constant 0 : index
      %17 = vector.load %arg11[%c0_17, %c0_18] : memref<2x128xf32, #tpu.memory_space<vmem>>, vector<2x128xf32>
      tpu.vector_store %arg11[%c0_17, %c0_18], %4 {strides = array<i32>} : memref<2x128xf32, #tpu.memory_space<vmem>>, vector<2x128xf32>,
      %c0_19 = arith.constant 0 : index
      %c0_20 = arith.constant 0 : index
      %18 = vector.load %arg12[%c0_19, %c0_20] : memref<2x128xf32, #tpu.memory_space<vmem>>, vector<2x128xf32>
      tpu.vector_store %arg12[%c0_19, %c0_20], %5 {strides = array<i32>} : memref<2x128xf32, #tpu.memory_space<vmem>>, vector<2x128xf32>,
    } else {
    }
    %c0_i32_9 = arith.constant 0 : i32
    %9 = arith.cmpi sgt, %arg1, %c0_i32_9 : i32
    %10 = arith.extui %9 : i1 to i32
    %c0_i32_10 = arith.constant 0 : i32
    %11 = arith.cmpi ne, %10, %c0_i32_10 : i32
    scf.if %11 {
      %c0_13 = arith.constant 0 : index
      %c0_14 = arith.constant 0 : index
      %15 = vector.load %arg9[%c0_13, %c0_14] : memref<2x128xf32, #tpu.memory_space<vmem>>, vector<2x128xf32>
      %16 = arith.addf %15, %2 : vector<2x128xf32>
      %c0_15 = arith.constant 0 : index
      %c0_16 = arith.constant 0 : index
      %17 = vector.load %arg9[%c0_15, %c0_16] : memref<2x128xf32, #tpu.memory_space<vmem>>, vector<2x128xf32>
      tpu.vector_store %arg9[%c0_15, %c0_16], %16 {strides = array<i32>} : memref<2x128xf32, #tpu.memory_space<vmem>>, vector<2x128xf32>,
      %c0_17 = arith.constant 0 : index
      %c0_18 = arith.constant 0 : index
      %18 = vector.load %arg10[%c0_17, %c0_18] : memref<2x128xf32, #tpu.memory_space<vmem>>, vector<2x128xf32>
      %19 = arith.maximumf %18, %3 : vector<2x128xf32>
      %c0_19 = arith.constant 0 : index
      %c0_20 = arith.constant 0 : index
      %20 = vector.load %arg10[%c0_19, %c0_20] : memref<2x128xf32, #tpu.memory_space<vmem>>, vector<2x128xf32>
      tpu.vector_store %arg10[%c0_19, %c0_20], %19 {strides = array<i32>} : memref<2x128xf32, #tpu.memory_space<vmem>>, vector<2x128xf32>,
      %c0_21 = arith.constant 0 : index
      %c0_22 = arith.constant 0 : index
      %21 = vector.load %arg11[%c0_21, %c0_22] : memref<2x128xf32, #tpu.memory_space<vmem>>, vector<2x128xf32>
      %22 = arith.addf %21, %4 : vector<2x128xf32>
      %c0_23 = arith.constant 0 : index
      %c0_24 = arith.constant 0 : index
      %23 = vector.load %arg11[%c0_23, %c0_24] : memref<2x128xf32, #tpu.memory_space<vmem>>, vector<2x128xf32>
      tpu.vector_store %arg11[%c0_23, %c0_24], %22 {strides = array<i32>} : memref<2x128xf32, #tpu.memory_space<vmem>>, vector<2x128xf32>,
      %c0_25 = arith.constant 0 : index
      %c0_26 = arith.constant 0 : index
      %24 = vector.load %arg12[%c0_25, %c0_26] : memref<2x128xf32, #tpu.memory_space<vmem>>, vector<2x128xf32>
      %25 = arith.maximumf %24, %5 : vector<2x128xf32>
      %c0_27 = arith.constant 0 : index
      %c0_28 = arith.constant 0 : index
      %26 = vector.load %arg12[%c0_27, %c0_28] : memref<2x128xf32, #tpu.memory_space<vmem>>, vector<2x128xf32>
      tpu.vector_store %arg12[%c0_27, %c0_28], %25 {strides = array<i32>} : memref<2x128xf32, #tpu.memory_space<vmem>>, vector<2x128xf32>,
    } else {
    }
    %c0_i32_11 = arith.constant 0 : i32
    %12 = arith.cmpi eq, %arg1, %c0_i32_11 : i32
    %13 = arith.extui %12 : i1 to i32
    %c0_i32_12 = arith.constant 0 : i32
    %14 = arith.cmpi ne, %13, %c0_i32_12 : i32
    scf.if %14 {
      %c0_13 = arith.constant 0 : index
      %c0_14 = arith.constant 0 : index
      %15 = vector.load %arg9[%c0_13, %c0_14] : memref<2x128xf32, #tpu.memory_space<vmem>>, vector<2x32xf32>
      %c0_15 = arith.constant 0 : index
      %c32 = arith.constant 32 : index
      %16 = vector.load %arg9[%c0_15, %c32] : memref<2x128xf32, #tpu.memory_space<vmem>>, vector<2x32xf32>
      %17 = arith.addf %15, %16 : vector<2x32xf32>
      %c0_16 = arith.constant 0 : index
      %c64 = arith.constant 64 : index
      %18 = vector.load %arg9[%c0_16, %c64] : memref<2x128xf32, #tpu.memory_space<vmem>>, vector<2x32xf32>
      %19 = arith.addf %17, %18 : vector<2x32xf32>
      %c0_17 = arith.constant 0 : index
      %c96 = arith.constant 96 : index
      %20 = vector.load %arg9[%c0_17, %c96] : memref<2x128xf32, #tpu.memory_space<vmem>>, vector<2x32xf32>
      %21 = arith.addf %19, %20 : vector<2x32xf32>
      %cst_18 = arith.constant 1.250000e-01 : f32
      %22 = vector.broadcast %cst_18 : f32 to vector<2x32xf32>
      %23 = arith.mulf %21, %22 : vector<2x32xf32>
      %c0_19 = arith.constant 0 : index
      %c0_20 = arith.constant 0 : index
      %24 = vector.load %arg13[%c0_19, %c0_20] : memref<2x128xf32, #tpu.memory_space<vmem>>, vector<2x32xf32>
      tpu.vector_store %arg13[%c0_19, %c0_20], %23 {strides = array<i32>} : memref<2x128xf32, #tpu.memory_space<vmem>>, vector<2x32xf32>,
      %c0_21 = arith.constant 0 : index
      %c0_22 = arith.constant 0 : index
      %25 = vector.load %arg10[%c0_21, %c0_22] : memref<2x128xf32, #tpu.memory_space<vmem>>, vector<2x32xf32>
      %c0_23 = arith.constant 0 : index
      %c32_24 = arith.constant 32 : index
      %26 = vector.load %arg10[%c0_23, %c32_24] : memref<2x128xf32, #tpu.memory_space<vmem>>, vector<2x32xf32>
      %27 = arith.maximumf %25, %26 : vector<2x32xf32>
      %c0_25 = arith.constant 0 : index
      %c64_26 = arith.constant 64 : index
      %28 = vector.load %arg10[%c0_25, %c64_26] : memref<2x128xf32, #tpu.memory_space<vmem>>, vector<2x32xf32>
      %29 = arith.maximumf %27, %28 : vector<2x32xf32>
      %c0_27 = arith.constant 0 : index
      %c96_28 = arith.constant 96 : index
      %30 = vector.load %arg10[%c0_27, %c96_28] : memref<2x128xf32, #tpu.memory_space<vmem>>, vector<2x32xf32>
      %31 = arith.maximumf %29, %30 : vector<2x32xf32>
      %c0_29 = arith.constant 0 : index
      %c32_30 = arith.constant 32 : index
      %32 = vector.load %arg13[%c0_29, %c32_30] : memref<2x128xf32, #tpu.memory_space<vmem>>, vector<2x32xf32>
      tpu.vector_store %arg13[%c0_29, %c32_30], %31 {strides = array<i32>} : memref<2x128xf32, #tpu.memory_space<vmem>>, vector<2x32xf32>,
      %c0_31 = arith.constant 0 : index
      %c0_32 = arith.constant 0 : index
      %33 = vector.load %arg11[%c0_31, %c0_32] : memref<2x128xf32, #tpu.memory_space<vmem>>, vector<2x32xf32>
      %c0_33 = arith.constant 0 : index
      %c32_34 = arith.constant 32 : index
      %34 = vector.load %arg11[%c0_33, %c32_34] : memref<2x128xf32, #tpu.memory_space<vmem>>, vector<2x32xf32>
      %35 = arith.addf %33, %34 : vector<2x32xf32>
      %c0_35 = arith.constant 0 : index
      %c64_36 = arith.constant 64 : index
      %36 = vector.load %arg11[%c0_35, %c64_36] : memref<2x128xf32, #tpu.memory_space<vmem>>, vector<2x32xf32>
      %37 = arith.addf %35, %36 : vector<2x32xf32>
      %c0_37 = arith.constant 0 : index
      %c96_38 = arith.constant 96 : index
      %38 = vector.load %arg11[%c0_37, %c96_38] : memref<2x128xf32, #tpu.memory_space<vmem>>, vector<2x32xf32>
      %39 = arith.addf %37, %38 : vector<2x32xf32>
      %cst_39 = arith.constant 1.250000e-01 : f32
      %40 = vector.broadcast %cst_39 : f32 to vector<2x32xf32>
      %41 = arith.mulf %39, %40 : vector<2x32xf32>
      %c0_40 = arith.constant 0 : index
      %c64_41 = arith.constant 64 : index
      %42 = vector.load %arg13[%c0_40, %c64_41] : memref<2x128xf32, #tpu.memory_space<vmem>>, vector<2x32xf32>
      tpu.vector_store %arg13[%c0_40, %c64_41], %41 {strides = array<i32>} : memref<2x128xf32, #tpu.memory_space<vmem>>, vector<2x32xf32>,
      %c0_42 = arith.constant 0 : index
      %c0_43 = arith.constant 0 : index
      %43 = vector.load %arg12[%c0_42, %c0_43] : memref<2x128xf32, #tpu.memory_space<vmem>>, vector<2x32xf32>
      %c0_44 = arith.constant 0 : index
      %c32_45 = arith.constant 32 : index
      %44 = vector.load %arg12[%c0_44, %c32_45] : memref<2x128xf32, #tpu.memory_space<vmem>>, vector<2x32xf32>
      %45 = arith.maximumf %43, %44 : vector<2x32xf32>
      %c0_46 = arith.constant 0 : index
      %c64_47 = arith.constant 64 : index
      %46 = vector.load %arg12[%c0_46, %c64_47] : memref<2x128xf32, #tpu.memory_space<vmem>>, vector<2x32xf32>
      %47 = arith.maximumf %45, %46 : vector<2x32xf32>
      %c0_48 = arith.constant 0 : index
      %c96_49 = arith.constant 96 : index
      %48 = vector.load %arg12[%c0_48, %c96_49] : memref<2x128xf32, #tpu.memory_space<vmem>>, vector<2x32xf32>
      %49 = arith.maximumf %47, %48 : vector<2x32xf32>
      %c0_50 = arith.constant 0 : index
      %c96_51 = arith.constant 96 : index
      %50 = vector.load %arg13[%c0_50, %c96_51] : memref<2x128xf32, #tpu.memory_space<vmem>>, vector<2x32xf32>
      tpu.vector_store %arg13[%c0_50, %c96_51], %49 {strides = array<i32>} : memref<2x128xf32, #tpu.memory_space<vmem>>, vector<2x32xf32>,
      %c0_52 = arith.constant 0 : index
      %c0_53 = arith.constant 0 : index
      %51 = vector.load %arg13[%c0_52, %c0_53] : memref<2x128xf32, #tpu.memory_space<vmem>>, vector<2x128xf32>
      %c0_54 = arith.constant 0 : index
      %c0_55 = arith.constant 0 : index
      %52 = vector.load %arg4[%c0_54, %c0_55] : memref<128x32xf32, #tpu.memory_space<vmem>>, vector<128x32xf32>
      %cst_56 = arith.constant dense<0.000000e+00> : vector<2x32xf32>
      %53 = tpu.matmul %51, %52, %cst_56 {dimension_numbers = #tpu.dot_dimension_numbers<[1], [0], [0], [1], [0, 0, 1, 1], [], []>} : vector<2x128xf32>, vector<128x32xf32>, vector<2x32xf32> -> vector<2x32xf32>
      %c0_57 = arith.constant 0 : index
      %c0_58 = arith.constant 0 : index
      %54 = vector.load %arg5[%c0_57, %c0_58] : memref<1x32xf32, #tpu.memory_space<vmem>>, vector<1x32xf32>
      %55 = vector.broadcast %54 : vector<1x32xf32> to vector<2x32xf32>
      %56 = arith.addf %53, %55 : vector<2x32xf32>
      %57 = math.tanh %56 : vector<2x32xf32>
      %c0_59 = arith.constant 0 : index
      %c0_60 = arith.constant 0 : index
      %58 = vector.load %arg6[%c0_59, %c0_60] : memref<32x4xf32, #tpu.memory_space<vmem>>, vector<32x4xf32>
      %cst_61 = arith.constant dense<0.000000e+00> : vector<2x4xf32>
      %59 = tpu.matmul %57, %58, %cst_61 {dimension_numbers = #tpu.dot_dimension_numbers<[1], [0], [0], [1], [0, 0, 1, 1], [], []>} : vector<2x32xf32>, vector<32x4xf32>, vector<2x4xf32> -> vector<2x4xf32>
      %c0_62 = arith.constant 0 : index
      %c0_63 = arith.constant 0 : index
      %60 = vector.load %arg7[%c0_62, %c0_63] : memref<1x4xf32, #tpu.memory_space<vmem>>, vector<1x4xf32>
      %61 = vector.broadcast %60 : vector<1x4xf32> to vector<2x4xf32>
      %62 = arith.addf %59, %61 : vector<2x4xf32>
      %c0_64 = arith.constant 0 : index
      %c0_65 = arith.constant 0 : index
      %63 = vector.load %arg8[%c0_64, %c0_65] : memref<2x4xf32, #tpu.memory_space<vmem>>, vector<2x4xf32>
      tpu.vector_store %arg8[%c0_64, %c0_65], %62 {strides = array<i32>} : memref<2x4xf32, #tpu.memory_space<vmem>>, vector<2x4xf32>,
    } else {
    }
    return
  }
  func.func @transform_0(%arg0: i32, %arg1: i32) -> (i32, i32, i32) {
    %c0_i32 = arith.constant 0 : i32
    %c0_i32_0 = arith.constant 0 : i32
    return %arg0, %arg1, %c0_i32 : i32, i32, i32
  }
  func.func @transform_1(%arg0: i32, %arg1: i32) -> (i32, i32, i32) {
    %c0_i32 = arith.constant 0 : i32
    %c0_i32_0 = arith.constant 0 : i32
    return %arg0, %arg1, %c0_i32 : i32, i32, i32
  }
  func.func @transform_2(%arg0: i32, %arg1: i32) -> (i32, i32) {
    %c0_i32 = arith.constant 0 : i32
    %c0_i32_0 = arith.constant 0 : i32
    %c0_i32_1 = arith.constant 0 : i32
    return %c0_i32, %c0_i32_0 : i32, i32
  }
  func.func @transform_3(%arg0: i32, %arg1: i32) -> (i32, i32) {
    %c0_i32 = arith.constant 0 : i32
    %c0_i32_0 = arith.constant 0 : i32
    %c0_i32_1 = arith.constant 0 : i32
    return %c0_i32, %c0_i32_0 : i32, i32
  }
  func.func @transform_4(%arg0: i32, %arg1: i32) -> (i32, i32) {
    %c0_i32 = arith.constant 0 : i32
    %c0_i32_0 = arith.constant 0 : i32
    %c0_i32_1 = arith.constant 0 : i32
    return %c0_i32, %c0_i32_0 : i32, i32
  }
  func.func @transform_5(%arg0: i32, %arg1: i32) -> (i32, i32) {
    %c0_i32 = arith.constant 0 : i32
    %c0_i32_0 = arith.constant 0 : i32
    %c0_i32_1 = arith.constant 0 : i32
    return %c0_i32, %c0_i32_0 : i32, i32
  }
  func.func @transform_6(%arg0: i32, %arg1: i32) -> (i32, i32) {
    %c0_i32 = arith.constant 0 : i32
    %c0_i32_0 = arith.constant 0 : i32
    return %arg0, %c0_i32 : i32, i32
  }
}

</mosaic_0001>

<bundles_post_ra>
// kernel: tpu_custom_call.1
= control target key start
LH: loop header
LB: loop body
LE: loop exit
PB: predicated region body
PF: predicated region fallthrough
CT: control target
= control target key end

     0   :  { %vm28_vm0 = vcmask 1041408   ;;  %vm91_vm1 = vcmask 1041409   ;;  %s735_s0 = inlined_call_operand.vmem [shape: f32[2,2,128], index: 0, kind: input, shape index: {}]   ;;  %s736_s1 = inlined_call_operand.vmem [shape: f32[2,2,128], index: 1, kind: input, shape index: {}]   ;;  %s737_s2 = inlined_call_operand.vmem [shape: f32[128,32], index: 2, kind: input, shape index: {}]   ;;  %s738_s3 = inlined_call_operand.vmem [shape: f32[1,32], index: 3, kind: input, shape index: {}]   ;;  %s739_s4 = inlined_call_operand.vmem [shape: f32[32,4], index: 4, kind: input, shape index: {}]   ;;  %s740_s5 = inlined_call_operand.vmem [shape: f32[1,4], index: 5, kind: input, shape index: {}]   ;;  %s741_s6 = inlined_call_operand.hbm [shape: f32[2,4], index: 6, kind: output, shape index: {}]  }
   0x1   :  { %v26_v0 = vld [vmem:[%s736_s1] sm:$0x3]  ;;  %v27_v1 = vld [vmem:[%s736_s1 + $0x2] sm:$0x3] }
   0x2   :  { %v57_v2 = vsel %vm28_vm0, %v26_v0, 0.0  ;;  %v64_v3 = vsel %vm28_vm0, %v27_v1, 0.0  ;;  %v24_v4 = vld [vmem:[%s735_s0] sm:$0x3]  ;;  %v25_v7 = vld [vmem:[%s735_s0 + $0x2] sm:$0x3] }
   0x3   :  { %v58_v5 = vrot.slane %v57_v2, 4  ;;  %v65_v6 = vrot.slane %v64_v3, 4  ;;  %v43_v8 = vsel %vm28_vm0, %v24_v4, -inf  ;;  %v50_v10 = vsel %vm28_vm0, %v25_v7, -inf }
   0x4   :  { %v44_v9 = vrot.slane %v43_v8, 4  ;;  %v71_v11 = vsel %vm28_vm0, %v26_v0, -inf  ;;  %v78_v12 = vsel %vm28_vm0, %v27_v1, -inf }
   0x5   :  { %11 = vsyncpa [#allocation8], 0  ;;  %v59_v13 = vadd.f32 %v58_v5, %v57_v2  ;;  %v66_v14 = vadd.f32 %v65_v6, %v64_v3  ;;  %v51_v15 = vrot.slane %v50_v10, 4  ;;  %v72_v16 = vrot.slane %v71_v11, 4  ;;  %s554_s0 = smov 64   ;;  %s555_s1 = smov 96  }
   0x6   :  { %v45_v17 = vmax.f32 %v43_v8, %v44_v9  ;;  %v79_v18 = vrot.slane %v78_v12, 4  ;;  %v29_v19 = vsel %vm28_vm0, %v24_v4, 0.0  ;;  %v36_v20 = vsel %vm28_vm0, %v25_v7, 0.0  ;;  %v225_v3 = vld [vmem:[%s737_s2] sm:$0xff]  ;;  %v226_v4 = vld [vmem:[%s737_s2 + $0x8] sm:$0xff]  ;;  %v227_v7 = vld [vmem:[%s737_s2 + $0x10] sm:$0xff] }
   0x7   :  { %v60_v21 = vrot.slane %v59_v13, 2  ;;  %v67_v22 = vrot.slane %v66_v14, 2  ;;  %v52_v23 = vmax.f32 %v50_v10, %v51_v15  ;;  %v73_v24 = vmax.f32 %v71_v11, %v72_v16  ;;  %v228_v8 = vld [vmem:[%s737_s2 + $0x18] sm:$0xff]  ;;  %s557_s13 = smov 32   ;;  %v229_v10 = vld [vmem:[%s737_s2 + $0x20] sm:$0xff]  ;;  %v230_v11 = vld [vmem:[%s737_s2 + $0x28] sm:$0xff] }
   0x8   :  { %v46_v25 = vrot.slane %v45_v17, 2  ;;  %v80_v26 = vmax.f32 %v78_v12, %v79_v18  ;;  %v30_v27 = vrot.slane %v29_v19, 4  ;;  %v37_v28 = vrot.slane %v36_v20, 4  ;;  %v232_v15 = vld [vmem:[%s737_s2 + $0x38] sm:$0xff]  ;;  %v234_v18 = vld [vmem:[%s737_s2 + $0x48] sm:$0xff] }
   0x9   :  { %v61_v29 = vadd.f32 %v60_v21, %v59_v13  ;;  %v68_v30 = vadd.f32 %v67_v22, %v66_v14  ;;  %v53_v31 = vrot.slane %v52_v23, 2  ;;  %v74_v32 = vrot.slane %v73_v24, 2  ;;  %v231_v14 = vld [vmem:[%s737_s2 + $0x30] sm:$0xff] }
   0xa   :  { %v47_v33 = vmax.f32 %v45_v17, %v46_v25  ;;  %v81_v34 = vrot.slane %v80_v26, 2  ;;  %v31_v35 = vadd.f32 %v30_v27, %v29_v19  ;;  %v38_v36 = vadd.f32 %v37_v28, %v36_v20  ;;  %v233_v17 = vld [vmem:[%s737_s2 + $0x40] sm:$0xff]  ;;  %v235_v22 = vld [vmem:[%s737_s2 + $0x50] sm:$0xff] }
   0xb   :  { %v62_v37 = vrot.slane %v61_v29, 1  ;;  %v69_v38 = vrot.slane %v68_v30, 1  ;;  %v54_v39 = vmax.f32 %v52_v23, %v53_v31  ;;  %v75_v40 = vmax.f32 %v73_v24, %v74_v32  ;;  %v236_v23 = vld [vmem:[%s737_s2 + $0x58] sm:$0xff]  ;;  %v237_v28 = vld [vmem:[%s737_s2 + $0x60] sm:$0xff]  ;;  %v239_v31 = vld [vmem:[%s737_s2 + $0x70] sm:$0xff] }
   0xc   :  { %v48_v41 = vrot.slane %v47_v33, 1  ;;  %v82_v42 = vmax.f32 %v80_v26, %v81_v34  ;;  %v32_v43 = vrot.slane %v31_v35, 2  ;;  %v39_v44 = vrot.slane %v38_v36, 2  ;;  %v240_v32 = vld [vmem:[%s737_s2 + $0x78] sm:$0xff] }
   0xd   :  { %v63_v45 = vadd.f32 %v62_v37, %v61_v29  ;;  %v70_v46 = vadd.f32 %v69_v38, %v68_v30  ;;  %v55_v47 = vrot.slane %v54_v39, 1  ;;  %v76_v48 = vrot.slane %v75_v40, 1  ;;  %v238_v29 = vld [vmem:[%s737_s2 + $0x68] sm:$0xff] }
   0xe   :  { %v49_v49 = vmax.f32 %v47_v33, %v48_v41  ;;  %v83_v50 = vrot.slane %v82_v42, 1  ;;  %v33_v51 = vadd.f32 %v32_v43, %v31_v35  ;;  %v40_v52 = vadd.f32 %v39_v44, %v38_v36 }
   0xf   :  { %v102_v53 = vsel %vm91_vm1, %v70_v46, %v63_v45  ;;  %v56_v54 = vmax.f32 %v54_v39, %v55_v47  ;;  %v77_v55 = vmax.f32 %v75_v40, %v76_v48  ;;  %v556_v5 = vmov 0.0|0.0  }
  0x10   :  { %104 = vst [vmem:[#allocation4] sm:$0x3] %v102_v53  ;;  %v84_v56 = vmax.f32 %v82_v42, %v83_v50  ;;  %v34_v57 = vrot.slane %v33_v51, 1  ;;  %v41_v58 = vrot.slane %v40_v52, 1  ;;  %491 = vmatprep.subr.bf16.mxu0 %v556_v5  ;;  %v492_v6 = vpack.c.bf16 %v226_v4, %v225_v3  ;;  %515 = vmatprep.subr.bf16.mxu1 %v556_v5 }
  0x11   :  { %v97_v59 = vsel %vm91_vm1, %v56_v54, %v49_v49  ;;  %v495_v9 = vpack.c.bf16 %v228_v8, %v227_v7  ;;  %v498_v13 = vpack.c.bf16 %v230_v11, %v229_v10  ;;  %v501_v16 = vpack.c.bf16 %v232_v15, %v231_v14  ;;  %v421_v8 = vld [vmem:[%s740_s5] ss:$0 sm:$0xff] }
  0x12   :  { %99 = vst [vmem:[#allocation3] sm:$0x3] %v97_v59  ;;  %v107_v60 = vsel %vm91_vm1, %v84_v56, %v77_v55  ;;  %v35_v61 = vadd.f32 %v34_v57, %v33_v51  ;;  %v42_v62 = vadd.f32 %v41_v58, %v40_v52  ;;  %493 = vmatpush3.bf16.msra.mxu0 %v492_v6  ;;  %vm558_vm2 = vmmov 0  }
  0x13   :  { %109 = vst [vmem:[#allocation5] sm:$0x3] %v107_v60  ;;  %494 = vmatprep.subr.bf16.mxu0 %v556_v5  ;;  %v504_v19 = vpack.c.bf16 %v234_v18, %v233_v17  ;;  %v507_v24 = vpack.c.bf16 %v236_v23, %v235_v22  ;;  %v510_v30 = vpack.c.bf16 %v238_v29, %v237_v28  ;;  %v559_v36 = vmov 0.0   ;;  %v319_v60 = vld [vmem:[%s739_s4] sm:$0xff] }
  0x14   :  { %v92_v63 = vsel %vm91_vm1, %v42_v62, %v35_v61  ;;  %v513_v35 = vpack.c.bf16 %v240_v32, %v239_v31  ;;  %477 = vmatprep.mubr.msk.f32.mxu0 %vm558_vm2, %v559_v36  ;;  %488 = vmatprep.mubr.msk.f32.mxu1 %vm558_vm2, %v559_v36  ;;  %vm161_vm3 = vcmask 254976   ;;  %vm181_vm4 = vcmask 517376   ;;  %v320_v61 = vld [vmem:[%s739_s4 + $0x8] sm:$0xff]  ;;  %v321_v62 = vld [vmem:[%s739_s4 + $0x10] sm:$0xff] }
  0x15   :  { %94 = vst [vmem:[#allocation2] sm:$0x3] %v92_v63  ;;  %vm202_vm5 = vcmask 779776   ;;  %vm222_vm6 = vcmask 1042176   ;;  %v516_v63 = vpack.c.bf16 %v320_v61, %v319_v60  ;;  %vm330_vm7 = vcmask 261120  }
  0x16   :  { %496 = vmatpush3.bf16.msra.mxu0 %v495_v9  ;;  %vm404_vm8 = vcmask 25600  }
  0x17   :  { %v183_v0 = vld [vmem:[#allocation4] sm:$0x3]  ;;  %497 = vmatprep.subr.bf16.mxu0 %v556_v5  ;;  %517 = vmatpush3.bf16.msra.mxu1 %v516_v63 }
  0x18   :  { %189 = vrot.lane.b32.xlu1 %v183_v0, %s554_s0  ;;  %185 = vrot.lane.b32.xlu0 %v183_v0, %s555_s1 }
  0x19   :  { %v622_v1 = vld [vmem:[#allocation3] sm:$0x3]  ;;  %518 = vmatprep.subr.bf16.mxu1 %v556_v5 }
  0x1a   :  { %v628_v2 = vld [vmem:[#allocation5] sm:$0x3]  ;;  %499 = vmatpush3.bf16.msra.mxu0 %v498_v13 }
  0x1b   :  { %500 = vmatprep.subr.bf16.mxu0 %v556_v5 }
  0x1c   :  { %169 = vrot.lane.b32.xlu1 %v622_v1, %s554_s0  ;;  %165 = vrot.lane.b32.xlu0 %v622_v1, %s555_s1  ;;  %v146_v12 = vld [vmem:[#allocation2] sm:$0x3] }
  0x1e   :  { %502 = vmatpush3.bf16.msra.mxu0 %v501_v16 }
  0x1f   :  { %503 = vmatprep.subr.bf16.mxu0 %v556_v5 }
  0x20   :  { %193 = vrot.lane.b32.xlu1 %v183_v0, %s557_s13  ;;  %206 = vrot.lane.b32.xlu0 %v628_v2, %s555_s1 }
  0x22   :  { %505 = vmatpush3.bf16.msra.mxu0 %v504_v19 }
  0x23   :  { %506 = vmatprep.subr.bf16.mxu0 %v556_v5 }
  0x24   :  { %210 = vrot.lane.b32.xlu1 %v628_v2, %s554_s0  ;;  %173 = vrot.lane.b32.xlu0 %v622_v1, %s557_s13 }
  0x26   :  { %508 = vmatpush3.bf16.msra.mxu0 %v507_v24 }
  0x27   :  { %509 = vmatprep.subr.bf16.mxu0 %v556_v5 }
  0x28   :  { %214 = vrot.lane.b32.xlu0 %v628_v2, %s557_s13  ;;  %148 = vrot.lane.b32.xlu1 %v146_v12, %s555_s1 }
  0x2a   :  { %511 = vmatpush3.bf16.msra.mxu0 %v510_v30 }
  0x2b   :  { %512 = vmatprep.subr.bf16.mxu0 %v556_v5 }
  0x2c   :  { %152 = vrot.lane.b32.xlu0 %v146_v12, %s554_s0  ;;  %156 = vrot.lane.b32.xlu1 %v146_v12, %s557_s13 }
  0x2e   :  { %514 = vmatpush3.bf16.msra.mxu0 %v513_v35 }
  0x8a   :  { %v190_v20 = vpop.permute.xlu1 %189  ;;  %v186_v21 = vpop.permute.xlu0 %185 }
  0x8b   :  { %v188_v25 = vadd.f32 %v186_v21, %v183_v0  ;;  %v322_v0 = vld [vmem:[%s739_s4 + $0x18] sm:$0xff]  ;;  %s560_s4 = smov [#allocation7]  }
  0x8c   :  { %s412_s23 = sshll.u32 %s560_s4, 4  ;;  %s413_s23 = int_to_ptr.vmem [resolvable:$true] %s412_s23 }
  0x8d   :  { %v192_v34 = vadd.f32 %v190_v20, %v188_v25  ;;  %p535_p1 = scmp.lt.s32.totalorder %s413_s23, %s413_s23 }
  0x8e   :  { %v170_v26 = vpop.permute.xlu1 %169  ;;  %v166_v27 = vpop.permute.xlu0 %165 }
  0x8f   :  { %v168_v33 = vmax.f32 %v622_v1, %v166_v27  ;;  %v519_v1 = vpack.c.bf16 %v322_v0, %v321_v62 }
  0x91   :  { %v172_v41 = vmax.f32 %v168_v33, %v170_v26  ;;  %520 = vmatpush3.bf16.msra.mxu1 %v519_v1 }
  0x92   :  { %v194_v37 = vpop.permute.xlu1 %193  ;;  %v207_v38 = vpop.permute.xlu0 %206 }
  0x93   :  { %v196_v39 = vadd.f32 %v194_v37, %v192_v34  ;;  %v209_v44 = vmax.f32 %v628_v2, %v207_v38  ;;  %v420_v2 = vld [vmem:[%s738_s3] ss:$0 sm:$0xff]  ;;  %s530_s3 = scalar_lea.vmem %s413_s23, 32 }
  0x94   :  { %p531_p0 = scmp.ne.s32.totalorder %s413_s23, %s530_s3  ;;  %p536_p2 = scmp.lt.s32.totalorder %s530_s3, %s530_s3 }
  0x95   :  { %v197_v40 = vmul.f32 0.125, %v196_v39 }
  0x96   :  { %v211_v42 = vpop.permute.xlu1 %210  ;;  %v174_v43 = vpop.permute.xlu0 %173  ;;  %p537_p3 = por %p536_p2, %p535_p1 }
  0x97   :  { %v176_v45 = vmax.f32 %v172_v41, %v174_v43  ;;  %199 = vrot.lane.b32.xlu1 %v197_v40, %s554_s0  ;;  %v213_v46 = vmax.f32 %v209_v44, %v211_v42 }
  0x98   :  { %p538_p4 = pnand %p537_p3, %p531_p0 }
  0x99   :  { %178 = vrot.lane.b32.xlu0 %v176_v45, %s557_s13 }
  0x9a   :  { %v215_v47 = vpop.permute.xlu0 %214  ;;  %v149_v48 = vpop.permute.xlu1 %148 }
  0x9b   :  { %v217_v49 = vmax.f32 %v213_v46, %v215_v47  ;;  %v151_v50 = vadd.f32 %v149_v48, %v146_v12 }
  0x9d   :  { %219 = vrot.lane.b32.xlu0 %v217_v49, %s555_s1 }
  0x9e   :  { %v153_v51 = vpop.permute.xlu0 %152  ;;  %v157_v52 = vpop.permute.xlu1 %156 }
  0x9f   :  { %v155_v53 = vadd.f32 %v153_v51, %v151_v50 }
  0xa1   :  { %v159_v54 = vadd.f32 %v157_v52, %v155_v53 }
  0xa3   :  { %v160_v55 = vmul.f32 0.125, %v159_v54 }
  0xa5   :  { %162 = vst.msk [vmem:[#allocation6] sm:$0x3] %vm161_vm3, %v160_v55 }
 0x109   :  { %v200_v57 = vpop.permute.xlu1 %199 }
 0x10b   :  { %v179_v56 = vpop.permute.xlu0 %178 }
 0x10c   :  { %182 = vst.msk [vmem:[#allocation6] sm:$0x3] %vm181_vm4, %v179_v56 }
 0x10d   :  { %203 = vst.msk [vmem:[#allocation6] sm:$0x3] %vm202_vm5, %v200_v57 }
 0x10f   :  { %v220_v58 = vpop.permute.xlu0 %219 }
 0x110   :  { %223 = vst.msk [vmem:[#allocation6] sm:$0x3] %vm222_vm6, %v220_v58 }
 0x117   :  { %v224_v59 = vld [vmem:[#allocation6] sm:$0x3] }
 0x118   :  { %478 = vmatmul.mubr.f32.vlgmr.msra.gmra.mrb[0].mxu0 %v224_v59 }
 0x1eb   :  { %v314_v3 = vpop.f32.mrb[0].mxu0 }
 0x1ec   :  { %v315_v4 = vadd.f32 %v420_v2, %v314_v3  ;;  %v479_v6 = vpop.f32.mrb[1].mxu0 }
 0x1ee   :  { %528 = vtanh.f32 %v315_v4 }
 0x1f8   :  { %v529_v7 = vpop.eup %528 }
 0x1f9   :  { %489 = vmatmul.mubr.msk.f32.vlgmr.msra.gmra.mrb[0].mxu1 %vm330_vm7, %v529_v7 }
 0x2cc   :  { %v400_v9 = vpop.f32.mrb[0].mxu1 }
 0x2cd   :  { %v401_v5 = vadd.f32 %v421_v8, %v400_v9  ;;  %v490_v10 = vpop.f32.mrb[1].mxu1 }
 0x2cf   :  { %405 = vst.msk [vmem:[#allocation7] sm:$0x3] %vm404_vm8, %v401_v5 }
 0x2d0   :  { %541 = shalt.err (!%p538_p4)
}
 0x2d1   :  { %s542_s26 = scalar_lea.hbm %s741_s6, 32 }
 0x2d2   :  { %p543_p5 = scmp.ne.s32.totalorder %s741_s6, %s542_s26  ;;  %p546_p6 = scmp.lt.u32.totalorder %s542_s26, %s741_s6 }
 0x2d4   :  { %p548_p7 = pnand %p546_p6, %p543_p5 }
 0x2d6   :  { %551 = shalt.err (!%p548_p7)
}
 0x2d7   :  { %415 = dma.vmem_to_hbm [thread:$0]  %s413_s23, 32, %s741_s6, [#allocation8]  }
 0x2d8   :  { %552 = dma.done.wait [#allocation8], 32  }
 0x2d9   :  { %553 = vsyncadd [#allocation8], 4294967264 }
 0x2da   :  { %419 = vsyncpa [#allocation8], 1 }

</bundles_post_ra>
